<compile_context>
chip_gen: v7x
topology: tpu7x:2x2x1
jax: 0.10.0
libtpu: 0.0.40
codegen_flags: <defaults>
</compile_context>

<pallas_src>
import jax
import jax.numpy as jnp
from jax.experimental import pallas as pl
from jax.experimental.pallas import tpu as pltpu

_BOUND = 127.0        # max_bound for signed 8-bit
_MIN_BOUND = -128.0   # narrow_range=False (pytorch_quantization default)
_EPS = 1.0 / (1 << 24)

_LANE = 128           # lane-dense slab width (one full vreg lane row)
_TARGET_ROWS = 8192   # 8192 x 128 x 4 B = 4 MiB per operand block


# ------------------------------ kernel --------------------------------------

def _quant_add_kernel(scales_ref, x_ref, y_ref, o_ref):
    # scales_ref (SMEM f32[4]) = [dequant_s0, quant_s0, dequant_s1, quant_s1]
    dq0 = scales_ref[0]
    q0 = scales_ref[1]
    dq1 = scales_ref[2]
    q1 = scales_ref[3]
    x = x_ref[...].astype(jnp.float32)
    y = y_ref[...].astype(jnp.float32)
    xq = jnp.clip(jnp.round(x * q0), _MIN_BOUND, _BOUND) * dq0
    yq = jnp.clip(jnp.round(y * q1), _MIN_BOUND, _BOUND) * dq1
    o_ref[...] = (xq + yq).astype(o_ref.dtype)


# ------------------------------ wrapper --------------------------------------

def _cdiv(a, b):
    return -(-a // b)


def _round_up(a, m):
    return ((a + m - 1) // m) * m


def _two_tensorcores():
    """Best-effort detection of 2-TensorCore parts (v7x / v4 megacore)."""
    try:
        kind = jax.devices()[0].device_kind.lower()
    except Exception:
        return False
    return ("v7" in kind) or ("v4" in kind) or ("v5p" in kind)


def _choose_row_tile(rows, target_rows, two_tc):
    """Pick the row-block size for a (rows, _LANE) slab."""
    if rows <= 0:
        return 1
    # Single-TC chips: one maximal block minimizes per-step overhead.
    # 2-TC chips: split mid-size tensors so both cores get work.
    split_threshold = max(16, target_rows // 8) if two_tc else target_rows
    if rows <= split_threshold:
        return rows                       # block == full array dims (always legal)
    steps = max(2, _cdiv(rows, target_rows))
    if two_tc and steps % 2:
        steps += 1                        # balanced work across the 2 TensorCores
    return _round_up(_cdiv(rows, steps), 8)


def _fq_scales(amax):
    """(dequant_scale, quant_scale) with pytorch_quantization's zero-amax guard."""
    a = jnp.asarray(amax, jnp.float32).reshape(())
    valid = a > _EPS
    safe = jnp.where(valid, a, 1.0)
    quant_s = jnp.where(valid, _BOUND / safe, 0.0)          # amax<=eps -> quantize to 0
    dequant_s = jnp.where(valid, 1.0 / (_BOUND / safe), 0.0)  # ... and dequant to 0
    return dequant_s, quant_s


def quant_add(x, y, amax0=None, amax1=None, quantization=True,
              block_rows=_TARGET_ROWS):
    """QuantAdd.forward. x, y are NCHW (or any-shape) float arrays, same shape."""
    assert x.shape == y.shape and x.dtype == y.dtype

    if not quantization:
        # XLA's fused elementwise add already runs at the HBM roofline; a Pallas
        # path would only add reshape/dispatch overhead.
        return x + y

    assert amax0 is not None and amax1 is not None
    orig_shape = x.shape
    n = int(x.size)
    if n == 0:
        return x + y

    dq0, q0 = _fq_scales(amax0)
    dq1, q1 = _fq_scales(amax1)
    scales = jnp.stack([dq0, q0, dq1, q1]).astype(jnp.float32)

    xf = x.reshape(-1)
    yf = y.reshape(-1)
    padded = (n % _LANE) != 0
    if padded:
        total = _round_up(n, _LANE)
        xf = jnp.pad(xf, (0, total - n))
        yf = jnp.pad(yf, (0, total - n))
    else:
        total = n

    rows = total // _LANE
    x2 = xf.reshape(rows, _LANE)
    y2 = yf.reshape(rows, _LANE)

    row_tile = _choose_row_tile(rows, block_rows, _two_tensorcores())
    grid = (_cdiv(rows, row_tile),)   # ragged last block handled by Pallas masking

    blk = pl.BlockSpec((row_tile, _LANE), lambda i: (i, 0))
    out2 = pl.pallas_call(
        _quant_add_kernel,
        out_shape=jax.ShapeDtypeStruct((rows, _LANE), x.dtype),
        grid=grid,
        in_specs=[
            pl.BlockSpec(memory_space=pltpu.MemorySpace.SMEM),  # per-tensor scales
            blk,                                                # x slab
            blk,                                                # y slab
        ],
        out_specs=blk,
        compiler_params=pltpu.CompilerParams(
            dimension_semantics=("parallel",)),
    )(scales, x2, y2)

    out = out2.reshape(-1)
    if padded:
        out = out[:n]
    return out.reshape(orig_shape)


# ------------------------- pure-JAX reference -------------------------------

def _ref_fake_quant(v, amax):
    amax = jnp.asarray(amax, jnp.float32)
    scale = _BOUND / jnp.maximum(amax, _EPS)
    q = jnp.clip(jnp.round(v * scale), _MIN_BOUND, _BOUND) / scale
    return jnp.where(amax > _EPS, q, jnp.zeros_like(v))


def _ref_quant_add(x, y, amax0, amax1, quantization=True):
    if not quantization:
        return x + y
    return _ref_fake_quant(x, amax0) + _ref_fake_quant(y, amax1)


if __name__ == "__main__":
    key = jax.random.PRNGKey(0)
    kx, ky = jax.random.split(key)
    # small NCHW inputs: batch=2, channels=4, spatial=16
    x = jax.random.normal(kx, (2, 4, 16, 16), dtype=jnp.float32)
    y = jax.random.normal(ky, (2, 4, 16, 16), dtype=jnp.float32)

    # Deterministic "calibration" amax (per-tensor max-abs calibrator).
    amax0 = jnp.max(jnp.abs(x))
    amax1 = jnp.max(jnp.abs(y))

    # 1) quantized path, single block
    out_q = jax.block_until_ready(quant_add(x, y, amax0, amax1, quantization=True))
    ref_q = _ref_quant_add(x, y, amax0, amax1, quantization=True)
    assert jnp.allclose(out_q, ref_q, atol=1e-5, rtol=1e-5), "quantized path mismatch"

    # 2) multi-block path (forced small block to exercise the pipeline/grid)
    out_m = jax.block_until_ready(
        quant_add(x, y, amax0, amax1, quantization=True, block_rows=8))
    assert jnp.allclose(out_m, ref_q, atol=1e-5, rtol=1e-5), "multi-block path mismatch"

    # 3) multi-block with a ragged (masked) last block: rows=20, tile=8 -> grid=3
    kx3, ky3 = jax.random.split(jax.random.PRNGKey(2))
    xm = jax.random.normal(kx3, (2, 4, 20, 16), dtype=jnp.float32)
    ym = jax.random.normal(ky3, (2, 4, 20, 16), dtype=jnp.float32)
    am0 = jnp.max(jnp.abs(xm))
    am1 = jnp.max(jnp.abs(ym))
    out_mm = jax.block_until_ready(
        quant_add(xm, ym, am0, am1, quantization=True, block_rows=8))
    ref_mm = _ref_quant_add(xm, ym, am0, am1, quantization=True)
    assert jnp.allclose(out_mm, ref_mm, atol=1e-5, rtol=1e-5), "masked last-block mismatch"

    # 4) shape whose element count is not a multiple of 128 (pad fallback)
    kx2, ky2 = jax.random.split(jax.random.PRNGKey(1))
    xr = jax.random.normal(kx2, (2, 3, 5, 7), dtype=jnp.float32)
    yr = jax.random.normal(ky2, (2, 3, 5, 7), dtype=jnp.float32)
    a0 = jnp.max(jnp.abs(xr))
    a1 = jnp.max(jnp.abs(yr))
    out_r = jax.block_until_ready(quant_add(xr, yr, a0, a1, quantization=True))
    ref_r = _ref_quant_add(xr, yr, a0, a1, quantization=True)
    assert jnp.allclose(out_r, ref_r, atol=1e-5, rtol=1e-5), "ragged-shape path mismatch"

    # 5) zero-amax guard: fake_quant(x, 0) must be all zeros (no NaNs)
    out_z = jax.block_until_ready(quant_add(x, y, 0.0, amax1, quantization=True))
    ref_z = _ref_quant_add(x, y, 0.0, amax1, quantization=True)
    assert jnp.allclose(out_z, ref_z, atol=1e-5, rtol=1e-5), "zero-amax guard mismatch"
    assert not bool(jnp.any(jnp.isnan(out_z))), "NaNs with zero amax"

    # 6) plain-add path (pure XLA, no Pallas)
    out_p = jax.block_until_ready(quant_add(x, y, quantization=False))
    assert jnp.allclose(out_p, x + y, atol=1e-6), "plain add path mismatch"

    print("KERNEL_OK")
</pallas_src>

<mosaic_0001>
module attributes {stable_mosaic.version = 11 : i64} {
  func.func @_quant_add_kernel(%arg0: i32, %arg1: memref<4xf32, #tpu.memory_space<smem>>, %arg2: memref<16x128xf32, #tpu.memory_space<vmem>>, %arg3: memref<16x128xf32, #tpu.memory_space<vmem>>, %arg4: memref<16x128xf32, #tpu.memory_space<vmem>>) attributes {dimension_semantics = [#tpu.dimension_semantics<parallel>], iteration_bounds = array<i64: 1>, scalar_prefetch = 0 : i64, scratch_operands = 0 : i64, tpu.core_type = #tpu.core_type<tc>, window_params = [{transform_indices = @transform_0, window_bounds = array<i64: 4>}, {transform_indices = @transform_1, window_bounds = array<i64: 16, 128>}, {transform_indices = @transform_2, window_bounds = array<i64: 16, 128>}, {transform_indices = @transform_3, window_bounds = array<i64: 16, 128>}]} {
    %c0 = arith.constant 0 : index
    %0 = memref.load %arg1[%c0] : memref<4xf32, #tpu.memory_space<smem>>
    %c1 = arith.constant 1 : index
    %1 = memref.load %arg1[%c1] : memref<4xf32, #tpu.memory_space<smem>>
    %c2 = arith.constant 2 : index
    %2 = memref.load %arg1[%c2] : memref<4xf32, #tpu.memory_space<smem>>
    %c3 = arith.constant 3 : index
    %3 = memref.load %arg1[%c3] : memref<4xf32, #tpu.memory_space<smem>>
    %c0_0 = arith.constant 0 : index
    %c0_1 = arith.constant 0 : index
    %4 = vector.load %arg2[%c0_0, %c0_1] : memref<16x128xf32, #tpu.memory_space<vmem>>, vector<16x128xf32>
    %c0_2 = arith.constant 0 : index
    %c0_3 = arith.constant 0 : index
    %5 = vector.load %arg3[%c0_2, %c0_3] : memref<16x128xf32, #tpu.memory_space<vmem>>, vector<16x128xf32>
    %6 = vector.broadcast %1 : f32 to vector<16x128xf32>
    %7 = arith.mulf %4, %6 : vector<16x128xf32>
    %8 = math.roundeven %7 : vector<16x128xf32>
    %cst = arith.constant -1.280000e+02 : f32
    %cst_4 = arith.constant 1.270000e+02 : f32
    %9 = vector.broadcast %cst : f32 to vector<16x128xf32>
    %10 = arith.maximumf %9, %8 : vector<16x128xf32>
    %11 = vector.broadcast %cst_4 : f32 to vector<16x128xf32>
    %12 = arith.minimumf %11, %10 : vector<16x128xf32>
    %13 = vector.broadcast %0 : f32 to vector<16x128xf32>
    %14 = arith.mulf %12, %13 : vector<16x128xf32>
    %15 = vector.broadcast %3 : f32 to vector<16x128xf32>
    %16 = arith.mulf %5, %15 : vector<16x128xf32>
    %17 = math.roundeven %16 : vector<16x128xf32>
    %cst_5 = arith.constant -1.280000e+02 : f32
    %cst_6 = arith.constant 1.270000e+02 : f32
    %18 = vector.broadcast %cst_5 : f32 to vector<16x128xf32>
    %19 = arith.maximumf %18, %17 : vector<16x128xf32>
    %20 = vector.broadcast %cst_6 : f32 to vector<16x128xf32>
    %21 = arith.minimumf %20, %19 : vector<16x128xf32>
    %22 = vector.broadcast %2 : f32 to vector<16x128xf32>
    %23 = arith.mulf %21, %22 : vector<16x128xf32>
    %24 = arith.addf %14, %23 : vector<16x128xf32>
    %c0_7 = arith.constant 0 : index
    %c0_8 = arith.constant 0 : index
    %25 = vector.load %arg4[%c0_7, %c0_8] : memref<16x128xf32, #tpu.memory_space<vmem>>, vector<16x128xf32>
    tpu.vector_store %arg4[%c0_7, %c0_8], %24 {strides = array<i32>} : memref<16x128xf32, #tpu.memory_space<vmem>>, vector<16x128xf32>,
    return
  }
  func.func @transform_0(%arg0: i32) -> i32 {
    %c0_i32 = arith.constant 0 : i32
    %c0_i32_0 = arith.constant 0 : i32
    return %c0_i32 : i32
  }
  func.func @transform_1(%arg0: i32) -> (i32, i32) {
    %c0_i32 = arith.constant 0 : i32
    %c0_i32_0 = arith.constant 0 : i32
    return %arg0, %c0_i32 : i32, i32
  }
  func.func @transform_2(%arg0: i32) -> (i32, i32) {
    %c0_i32 = arith.constant 0 : i32
    %c0_i32_0 = arith.constant 0 : i32
    return %arg0, %c0_i32 : i32, i32
  }
  func.func @transform_3(%arg0: i32) -> (i32, i32) {
    %c0_i32 = arith.constant 0 : i32
    %c0_i32_0 = arith.constant 0 : i32
    return %arg0, %c0_i32 : i32, i32
  }
}

</mosaic_0001>

<bundles_post_ra>
// kernel: tpu_custom_call.1
= control target key start
LH: loop header
LB: loop body
LE: loop exit
PB: predicated region body
PF: predicated region fallthrough
CT: control target
= control target key end

     0   :  { %8 = vsyncpa [#allocation5], 0  ;;  %s289_s0 = inlined_call_operand.hbm [shape: f32[4], index: 0, kind: input, shape index: {}]   ;;  %s290_s1 = inlined_call_operand.hbm [shape: f32[16,128], index: 1, kind: input, shape index: {}]   ;;  %s291_s2 = inlined_call_operand.hbm [shape: f32[16,128], index: 2, kind: input, shape index: {}]   ;;  %s292_s3 = inlined_call_operand.hbm [shape: f32[16,128], index: 3, kind: output, shape index: {}]  }
   0x1   :  { %9 = vsyncpa [#allocation3], 0 }
   0x2   :  { %10 = vsyncpa [#allocation8], 0 }
   0x3   :  { %11 = vsyncpa [#allocation4], 0  ;;  %s122_s14 = scalar_lea.hbm %s289_s0, 16 }
   0x4   :  { %p123_p0 = scmp.ne.s32.totalorder %s289_s0, %s122_s14  ;;  %p126_p1 = scmp.lt.u32.totalorder %s122_s14, %s289_s0 }
   0x6   :  { %p128_p2 = pnand %p126_p1, %p123_p0 }
   0x8   :  { %131 = shalt.err (!%p128_p2)
}
   0x9   :  { %s206_s19 = smov [#allocation2]   ;;  %s207_s22 = smov [#allocation6]  }
   0xa   :  { %19 = dma.hbm_to_smem %s289_s0, 16, %s206_s19, [#allocation5]  }
   0xb   :  { %s25_s23 = sshll.u32 %s207_s22, 4  ;;  %s132_s26 = scalar_lea.hbm %s290_s1, 256  ;;  %s26_s23 = int_to_ptr.vmem [resolvable:$true] %s25_s23 }
   0xc   :  { %p133_p3 = scmp.ne.s32.totalorder %s290_s1, %s132_s26  ;;  %p136_p4 = scmp.lt.u32.totalorder %s132_s26, %s290_s1 }
   0xe   :  { %p138_p5 = pnand %p136_p4, %p133_p3 }
  0x10   :  { %141 = shalt.err (!%p138_p5)
}
  0x11   :  { %s142_s4 = scalar_lea.vmem %s26_s23, 256  ;;  %p147_p7 = scmp.lt.s32.totalorder %s26_s23, %s26_s23 }
  0x12   :  { %p143_p6 = scmp.ne.s32.totalorder %s26_s23, %s142_s4  ;;  %p148_p8 = scmp.lt.s32.totalorder %s142_s4, %s142_s4 }
  0x14   :  { %p149_p9 = por %p148_p8, %p147_p7 }
  0x16   :  { %p150_p10 = pnand %p149_p9, %p143_p6 }
  0x18   :  { %153 = shalt.err (!%p150_p10)
}
  0x19   :  { %s208_s0 = smov 128   ;;  %s209_s5 = smov 8  }
  0x1a   :  { %31 = dma.hbm_to_vmem [thread:$0]  %s290_s1, 256, %s26_s23, [#allocation3], %s208_s0, %s208_s0, %s209_s5  }
  0x1b   :  { %s210_s8 = smov [#allocation7]   ;;  %s154_s12 = scalar_lea.hbm %s291_s2, 256 }
  0x1c   :  { %s37_s9 = sshll.u32 %s210_s8, 4  ;;  %p155_p11 = scmp.ne.s32.totalorder %s291_s2, %s154_s12  ;;  %s38_s9 = int_to_ptr.vmem [resolvable:$true] %s37_s9 }
  0x1d   :  { %p158_p12 = scmp.lt.u32.totalorder %s154_s12, %s291_s2 }
  0x1f   :  { %p160_p13 = pnand %p158_p12, %p155_p11 }
  0x21   :  { %163 = shalt.err (!%p160_p13)
}
  0x22   :  { %s164_s17 = scalar_lea.vmem %s38_s9, 256  ;;  %p169_p1 = scmp.lt.s32.totalorder %s38_s9, %s38_s9 }
  0x23   :  { %p165_p0 = scmp.ne.s32.totalorder %s38_s9, %s164_s17  ;;  %p170_p2 = scmp.lt.s32.totalorder %s164_s17, %s164_s17 }
  0x25   :  { %p171_p3 = por %p170_p2, %p169_p1 }
  0x27   :  { %p172_p4 = pnand %p171_p3, %p165_p0 }
  0x29   :  { %175 = shalt.err (!%p172_p4)
}
  0x2a   :  { %43 = dma.hbm_to_vmem [thread:$0]  %s291_s2, 256, %s38_s9, [#allocation8], %s208_s0, %s208_s0, %s209_s5  }
  0x2b   :  { %198 = dma.done.wait [#allocation5], 16  }
  0x2c   :  { %199 = vsyncadd [#allocation5], 4294967280 }
  0x2d   :  { %200 = dma.done.wait [#allocation3], 256  }
  0x2e   :  { %201 = vsyncadd [#allocation3], 4294967040 }
  0x2f   :  { %202 = dma.done.wait [#allocation8], 256  }
  0x30   :  { %203 = vsyncadd [#allocation8], 4294967040 }
  0x31   :  { %53 = sfence }
  0x32   :  { %s109_s19 = sld [smem:[#allocation2 + $0x1]]  ;;  %s111_s20 = sld [smem:[#allocation2 + $0x3]]  ;;  %v58_v0 = vld [vmem:[#allocation6] sm:$0xff]  ;;  %v59_v1 = vld [vmem:[#allocation6 + $0x8] sm:$0xff]  ;;  %v60_v2 = vld [vmem:[#allocation7] sm:$0xff] }
  0x33   :  { %s54_s21 = sld [smem:[#allocation2]]  ;;  %s110_s22 = sld [smem:[#allocation2 + $0x2]]  ;;  %v61_v3 = vld [vmem:[#allocation7 + $0x8] sm:$0xff] }
  0x34   :  { %s211_s2 = smov [#allocation9]  }
  0x35   :  { %s95_s23 = sshll.u32 %s211_s2, 4  ;;  %s96_s23 = int_to_ptr.vmem [resolvable:$true] %s95_s23 }
  0x36   :  { %s176_s24 = scalar_lea.vmem %s96_s23, 256  ;;  %p181_p6 = scmp.lt.s32.totalorder %s96_s23, %s96_s23 }
  0x37   :  { %p177_p5 = scmp.ne.s32.totalorder %s96_s23, %s176_s24  ;;  %p182_p7 = scmp.lt.s32.totalorder %s176_s24, %s176_s24 }
  0x38   :  { %v62_v4 = vstv %s109_s19  ;;  %v74_v6 = vstv %s111_s20 }
  0x39   :  { %v63_v5 = vmul.f32 %v62_v4, %v58_v0  ;;  %v64_v7 = vmul.f32 %v62_v4, %v59_v1  ;;  %v75_v8 = vmul.f32 %v74_v6, %v60_v2  ;;  %v76_v9 = vmul.f32 %v74_v6, %v61_v3  ;;  %p183_p8 = por %p182_p7, %p181_p6 }
  0x3a   :  { %v71_v16 = vstv %s54_s21  ;;  %v83_v20 = vstv %s110_s22 }
  0x3b   :  { %v112_v10 = vround.rtne.f32 %v63_v5  ;;  %v113_v11 = vround.rtne.f32 %v64_v7  ;;  %v114_v12 = vround.rtne.f32 %v75_v8  ;;  %v115_v13 = vround.rtne.f32 %v76_v9  ;;  %p184_p9 = pnand %p183_p8, %p177_p5 }
  0x3d   :  { %v67_v14 = vmax.f32 %v112_v10, -128.0  ;;  %v68_v15 = vmax.f32 %v113_v11, -128.0  ;;  %v79_v17 = vmax.f32 %v114_v12, -128.0  ;;  %v80_v18 = vmax.f32 %v115_v13, -128.0 }
  0x3f   :  { %v69_v19 = vmin.f32 %v67_v14, 127.0  ;;  %v70_v21 = vmin.f32 %v68_v15, 127.0  ;;  %v81_v22 = vmin.f32 %v79_v17, 127.0  ;;  %v82_v23 = vmin.f32 %v80_v18, 127.0 }
  0x41   :  { %v72_v24 = vmul.f32 %v71_v16, %v69_v19  ;;  %v73_v25 = vmul.f32 %v71_v16, %v70_v21  ;;  %v84_v26 = vmul.f32 %v83_v20, %v81_v22  ;;  %v85_v27 = vmul.f32 %v83_v20, %v82_v23 }
  0x43   :  { %v86_v28 = vadd.f32 %v84_v26, %v72_v24  ;;  %v87_v29 = vadd.f32 %v85_v27, %v73_v25 }
  0x45   :  { %88 = vst [vmem:[#allocation9] sm:$0xff] %v86_v28  ;;  %89 = vst [vmem:[#allocation9 + $0x8] sm:$0xff] %v87_v29 }
  0x46   :  { %187 = shalt.err (!%p184_p9)
}
  0x47   :  { %s188_s27 = scalar_lea.hbm %s292_s3, 256 }
  0x48   :  { %p189_p10 = scmp.ne.s32.totalorder %s292_s3, %s188_s27  ;;  %p192_p11 = scmp.lt.u32.totalorder %s188_s27, %s292_s3 }
  0x4a   :  { %p194_p12 = pnand %p192_p11, %p189_p10 }
  0x4c   :  { %197 = shalt.err (!%p194_p12)
}
  0x4d   :  { %101 = dma.vmem_to_hbm [thread:$0]  %s96_s23, 256, %s292_s3, [#allocation4], %s208_s0, %s208_s0, %s209_s5  }
  0x4e   :  { %204 = dma.done.wait [#allocation4], 256  }
  0x4f   :  { %205 = vsyncadd [#allocation4], 4294967040 }
  0x50   :  { %105 = vsyncpa [#allocation3], 1 }
  0x51   :  { %106 = vsyncpa [#allocation8], 1 }
  0x52   :  { %107 = vsyncpa [#allocation4], 1 }
  0x53   :  { %108 = vsyncpa [#allocation5], 1 }

</bundles_post_ra>
